<compile_context>
chip_gen: v7x
topology: tpu7x:2x2x1
jax: 0.10.0
libtpu: 0.0.40
codegen_flags: <defaults>
</compile_context>

<pallas_src>
import functools

import jax
import jax.numpy as jnp
from jax.experimental import pallas as pl
from jax.experimental.pallas import tpu as pltpu


def _round_up(x, m):
    return ((x + m - 1) // m) * m


def _gcn_max_kernel(r_ref, adj_ref, w_ref, b_ref, out_ref, vsplit_ref, *,
                    tile_n, tiles_per_split, n_valid, n_pad, split, split_pad,
                    p_pad, activation):
    s = pl.program_id(1)                 # node-split index (parallel, for v7x 2nd TC)
    i = pl.program_id(2)                 # node-tile index within the split (arbitrary)

    w = w_ref[...]                       # (in_f, p_pad)  bf16
    bias = b_ref[...]                    # (1, p_pad)     f32

    # Once per (batch, node-split): project ALL nodes onto the adjacency columns
    # (chunked so the f32 intermediate stays bounded) and reset the running max.
    @pl.when(i == 0)
    def _():
        n_chunks = n_pad // tile_n

        def _proj(c, carry):
            off = pl.multiple_of(c * tile_n, tile_n)
            blk = jnp.dot(r_ref[pl.ds(off, tile_n), :].astype(jnp.bfloat16),
                          w[:, :split_pad], preferred_element_type=jnp.float32)
            vsplit_ref[pl.ds(off, tile_n), :] = blk.astype(vsplit_ref.dtype)
            return carry

        jax.lax.fori_loop(0, n_chunks, _proj, 0)
        out_ref[...] = jnp.full(out_ref.shape, -jnp.inf, dtype=out_ref.dtype)

    tile_idx = s * tiles_per_split + i
    start = pl.multiple_of(tile_idx * tile_n, tile_n)

    # Graph aggregation for this row tile. adj is streamed f32 from HBM (single
    # use -> no host pre-pass) and cast to bf16 here for the MXU.
    a16 = adj_ref[...].astype(jnp.bfloat16)                          # (tile_n, n_pad)
    av = jnp.dot(a16, vsplit_ref[...],
                 preferred_element_type=jnp.float32)                 # (tile_n, split_pad)

    # Row-validity mask (only materialized when node padding exists).
    valid = None
    if n_pad != n_valid:
        row = start + jax.lax.broadcasted_iota(jnp.int32, (tile_n, 1), 0)
        valid = row < n_valid

    # Columns [0, split) come from adj@v; columns [split, split_pad) are the direct
    # projection already resident in vsplit -- identical to the torch.cat semantics.
    if split == split_pad:
        left = av
    else:
        vtile = vsplit_ref[pl.ds(start, tile_n), :].astype(jnp.float32)
        col = jax.lax.broadcasted_iota(jnp.int32, (tile_n, split_pad), 1)
        left = jnp.where(col < split, av, vtile)
    left = activation(left + bias[:, :split_pad])
    if valid is not None:
        left = jnp.where(valid, left, -jnp.inf)
    out_ref[:, :split_pad] = jnp.maximum(
        out_ref[:, :split_pad], jnp.max(left, axis=0, keepdims=True))

    # Columns >= split_pad never touch adj or vsplit: small per-tile projection only.
    if split_pad < p_pad:
        r16 = r_ref[pl.ds(start, tile_n), :].astype(jnp.bfloat16)
        right = jnp.dot(r16, w[:, split_pad:], preferred_element_type=jnp.float32)
        right = activation(right + bias[:, split_pad:])
        if valid is not None:
            right = jnp.where(valid, right, -jnp.inf)
        out_ref[:, split_pad:] = jnp.maximum(
            out_ref[:, split_pad:], jnp.max(right, axis=0, keepdims=True))


def gcn_max(r_s, adj, weight_w, bias, activation=jax.nn.relu, *, tile_n=512):
    """GCNMax forward. r_s: (N, in_f) or (B, N, in_f); adj: (N, N) or (B, N, N)."""
    squeeze_batch = (r_s.ndim == 2)
    if squeeze_batch:
        r_s, adj = r_s[None], adj[None]
    b_dim, n, in_f = r_s.shape
    assert adj.shape == (b_dim, n, n)
    p = weight_w.shape[1]
    split = p // 10
    assert split >= 1, "GCNMax expects print_length >= 10 (split = print_length // 10)"

    p_pad = _round_up(p, 128)
    split_pad = _round_up(split, 128)
    n_pad = _round_up(n, 128)            # pad N only to lane alignment, not to tile_n

    # Generation-aware VMEM budget (v5e/v6e: 128 MiB physical, v7x: 64 MiB).
    try:
        vmem_phys = int(pltpu.get_tpu_info().vmem_capacity_bytes)
    except Exception:
        vmem_phys = 64 << 20
    budget = (28 << 20) if vmem_phys >= (96 << 20) else (40 << 20)

    def est(t):
        f32, bf16 = 4, 2
        return (2 * t * n_pad * f32          # adj tile (f32 stream), double-buffered
                + t * n_pad * bf16           # in-kernel bf16 copy of the adj tile
                + 2 * n_pad * in_f * f32     # full r_s block (double-buffered)
                + 2 * in_f * p_pad * bf16    # W (double-buffered)
                + 4 * p_pad * f32            # bias + out block (double-buffered)
                + n_pad * split_pad * bf16   # vsplit scratch (single buffer)
                + t * split_pad * f32        # chunked step-0 projection intermediate
                + 3 * t * p_pad * f32)       # av / left / right temporaries

    # Largest tile in {1024, 512, 256, 128} that divides n_pad, honors the user cap
    # and fits the budget; floor at 128 (never tiny half-packed bf16 tiles).
    cap = max(int(tile_n), 128)
    cands = [t for t in (1024, 512, 256, 128)
             if t <= cap and t <= n_pad and n_pad % t == 0] or [128]
    tile = next((t for t in cands if est(t) <= budget), cands[-1])
    tiles_total = n_pad // tile

    est_tot = est(tile)
    compiler_kwargs = dict(dimension_semantics=("parallel", "parallel", "arbitrary"))
    if est_tot > (12 << 20):
        compiler_kwargs["vmem_limit_bytes"] = int(
            min(est_tot + (8 << 20), vmem_phys - (8 << 20)))

    # For the common un-batched call, split the node stream 2-way so v7x's second
    # TensorCore has work (each half keeps its own partial max; reduced below).
    n_split = 2 if (b_dim == 1 and tiles_total >= 2 and tiles_total % 2 == 0) else 1
    tiles_per_split = tiles_total // n_split

    # adj dominates HBM traffic: no pre-cast, no copy when N is already aligned.
    r_f = r_s if r_s.dtype == jnp.float32 else r_s.astype(jnp.float32)
    adj_f = adj if adj.dtype == jnp.float32 else adj.astype(jnp.float32)
    if n_pad != n:
        r_f = jnp.zeros((b_dim, n_pad, in_f), jnp.float32).at[:, :n, :].set(r_f)
        adj_f = jnp.zeros((b_dim, n_pad, n_pad), jnp.float32).at[:, :n, :n].set(adj_f)
    w_p = jnp.zeros((in_f, p_pad), jnp.bfloat16).at[:, :p].set(
        weight_w.astype(jnp.bfloat16))
    b_p = jnp.zeros((1, p_pad), jnp.float32).at[:, :p].set(
        bias.reshape(1, p).astype(jnp.float32))

    kernel = functools.partial(
        _gcn_max_kernel, tile_n=tile, tiles_per_split=tiles_per_split, n_valid=n,
        n_pad=n_pad, split=split, split_pad=split_pad, p_pad=p_pad,
        activation=activation)

    out = pl.pallas_call(
        kernel,
        out_shape=jax.ShapeDtypeStruct((b_dim * n_split, 1, p_pad), jnp.float32),
        grid=(b_dim, n_split, tiles_per_split),
        in_specs=[
            pl.BlockSpec((None, n_pad, in_f), lambda b, s, i: (b, 0, 0)),    # r_s (full, f32)
            pl.BlockSpec((None, tile, n_pad),
                         lambda b, s, i: (b, s * tiles_per_split + i, 0)),   # adj row tile (f32)
            pl.BlockSpec((in_f, p_pad), lambda b, s, i: (0, 0)),             # W (bf16)
            pl.BlockSpec((1, p_pad), lambda b, s, i: (0, 0)),                # bias (f32)
        ],
        out_specs=pl.BlockSpec((None, 1, p_pad),
                               lambda b, s, i: (b * n_split + s, 0, 0)),
        scratch_shapes=[pltpu.VMEM((n_pad, split_pad), jnp.bfloat16)],        # v_split
        compiler_params=pltpu.CompilerParams(**compiler_kwargs),
    )(r_f, adj_f, w_p, b_p)

    out = out.reshape(b_dim, n_split, p_pad).max(axis=1)[:, :p]
    return out[0] if squeeze_batch else out


def init_gcn_max_params(key, in_features, print_length):
    """Deterministic init mimicking GCNMax.reset_parameters (uniform ranges)."""
    k_w, k_b = jax.random.split(key)
    stdv_b = 6.0 / (print_length ** 0.5)
    stdv_w = 6.0 / ((in_features + print_length) ** 0.5)
    weight_w = jax.random.uniform(
        k_w, (in_features, print_length), jnp.float32, -stdv_w, stdv_w)
    bias = jax.random.uniform(k_b, (print_length,), jnp.float32, -stdv_b, stdv_b)
    return weight_w, bias


def _reference(r_s, adj, weight_w, bias, activation=jax.nn.relu):
    """Mirrors the kernel's numerics exactly: bf16 MXU operands, f32 accumulation,
    and bf16-resident v_split for columns [split, split_pad)."""
    p = weight_w.shape[1]
    split = p // 10
    sp = min(_round_up(split, 128), p)
    r16 = r_s.astype(jnp.bfloat16)
    a16 = adj.astype(jnp.bfloat16)
    w16 = weight_w.astype(jnp.bfloat16)
    v = jnp.dot(r16, w16, preferred_element_type=jnp.float32)         # (N, P) f32
    vs16 = v[:, :sp].astype(jnp.bfloat16)                              # kernel's vsplit
    av = jnp.dot(a16, vs16[:, :split], preferred_element_type=jnp.float32)
    mid = vs16[:, split:].astype(jnp.float32)                          # [split, sp)
    hi = v[:, sp:]                                                     # [sp, P) f32 direct
    vfull = jnp.concatenate([av, mid, hi], axis=1) + bias.astype(jnp.float32)
    return jnp.max(activation(vfull), axis=0)


def _reference_f32(r_s, adj, weight_w, bias, activation=jax.nn.relu):
    v = r_s @ weight_w
    split = v.shape[1] // 10
    v = jnp.concatenate([adj @ v[:, :split], v[:, split:]], axis=1) + bias
    return jnp.max(activation(v), axis=0)


if __name__ == "__main__":
    key = jax.random.PRNGKey(0)
    ks = jax.random.split(key, 8)

    IN_FEATURES, PRINT_LENGTH = 32, 40                 # split = 4
    weight_w, bias = init_gcn_max_params(ks[0], IN_FEATURES, PRINT_LENGTH)

    # ---- 1) single small graph (misaligned N -> pad + row-mask path) ----
    N = 8
    r_s = jax.random.normal(ks[1], (N, IN_FEATURES), jnp.float32)
    adj = jax.random.uniform(ks[2], (N, N), jnp.float32)
    out = jax.block_until_ready(gcn_max(r_s, adj, weight_w, bias, jax.nn.relu))
    assert out.shape == (PRINT_LENGTH,)
    ref = _reference(r_s, adj, weight_w, bias, jax.nn.relu)
    assert jnp.allclose(out, ref, atol=1e-3, rtol=1e-3), "mismatch vs bf16 reference"
    ref32 = _reference_f32(r_s, adj, weight_w, bias, jax.nn.relu)
    assert jnp.allclose(out, ref32, atol=0.5, rtol=0.05), "mismatch vs f32 reference"

    # ---- 2) batched graphs (parallel batch axis + node-row masking, tanh) ----
    B, N2 = 2, 12
    r_b = jax.random.normal(ks[3], (B, N2, IN_FEATURES), jnp.float32)
    adj_b = jax.random.uniform(ks[4], (B, N2, N2), jnp.float32)
    out_b = jax.block_until_ready(gcn_max(r_b, adj_b, weight_w, bias, jnp.tanh))
    assert out_b.shape == (B, PRINT_LENGTH)
    for bi in range(B):
        ref_bi = _reference(r_b[bi], adj_b[bi], weight_w, bias, jnp.tanh)
        assert jnp.allclose(out_b[bi], ref_bi, atol=1e-3, rtol=1e-3), "batched mismatch"

    # ---- 3) 128-aligned graph: zero host-side copies of adj, split_pad < p_pad
    #         (per-tile right-column dot exercised), 4 node tiles -> 2-way node
    #         split (both-TC path on v7x) ----
    N3, P3 = 512, 200
    w3, b3 = init_gcn_max_params(ks[5], IN_FEATURES, P3)
    r3 = jax.random.normal(ks[6], (N3, IN_FEATURES), jnp.float32)
    adj3 = jax.random.uniform(ks[7], (N3, N3), jnp.float32)
    out3 = jax.block_until_ready(gcn_max(r3, adj3, w3, b3, jax.nn.relu, tile_n=128))
    assert out3.shape == (P3,)
    ref3 = _reference(r3, adj3, w3, b3, jax.nn.relu)
    assert jnp.allclose(out3, ref3, atol=1e-3, rtol=1e-3), "aligned-graph mismatch"
    ref3_32 = _reference_f32(r3, adj3, w3, b3, jax.nn.relu)
    assert jnp.allclose(out3, ref3_32, atol=1.0, rtol=0.05), "aligned f32 mismatch"

    print("KERNEL_OK")
</pallas_src>

<mosaic_0001>
module attributes {stable_mosaic.version = 11 : i64} {
  func.func @_gcn_max_kernel(%arg0: i32, %arg1: i32, %arg2: i32, %arg3: memref<1x128x32xf32, #tpu.memory_space<vmem>>, %arg4: memref<1x128x128xf32, #tpu.memory_space<vmem>>, %arg5: memref<32x128xbf16, #tpu.memory_space<vmem>>, %arg6: memref<1x128xf32, #tpu.memory_space<vmem>>, %arg7: memref<1x1x128xf32, #tpu.memory_space<vmem>>, %arg8: memref<128x128xbf16, #tpu.memory_space<vmem>>) attributes {dimension_semantics = [#tpu.dimension_semantics<parallel>, #tpu.dimension_semantics<parallel>, #tpu.dimension_semantics<arbitrary>], iteration_bounds = array<i64: 1, 1, 1>, scalar_prefetch = 0 : i64, scratch_operands = 1 : i64, tpu.core_type = #tpu.core_type<tc>, window_params = [{transform_indices = @transform_0, window_bounds = array<i64: 1, 128, 32>}, {transform_indices = @transform_1, window_bounds = array<i64: 1, 128, 128>}, {pipeline_mode = #tpu.pipeline_mode<synchronous>, transform_indices = @transform_2, window_bounds = array<i64: 32, 128>}, {pipeline_mode = #tpu.pipeline_mode<synchronous>, transform_indices = @transform_3, window_bounds = array<i64: 1, 128>}, {transform_indices = @transform_4, window_bounds = array<i64: 1, 1, 128>}]} {
    %c0 = arith.constant 0 : index
    %c0_0 = arith.constant 0 : index
    %0 = vector.load %arg5[%c0, %c0_0] : memref<32x128xbf16, #tpu.memory_space<vmem>>, vector<32x128xbf16>
    %c0_1 = arith.constant 0 : index
    %c0_2 = arith.constant 0 : index
    %1 = vector.load %arg6[%c0_1, %c0_2] : memref<1x128xf32, #tpu.memory_space<vmem>>, vector<1x128xf32>
    %c0_i32 = arith.constant 0 : i32
    %2 = arith.cmpi eq, %arg2, %c0_i32 : i32
    %3 = arith.extui %2 : i1 to i32
    %c0_i32_3 = arith.constant 0 : i32
    %4 = arith.cmpi ne, %3, %c0_i32_3 : i32
    scf.if %4 {
      %c0_i32_19 = arith.constant 0 : i32
      %c128_i32_20 = arith.constant 128 : i32
      %42 = arith.muli %c0_i32_19, %c128_i32_20 : i32
      %43 = tpu.assume_multiple %42, 128 : i32
      %c0_21 = arith.constant 0 : index
      %44 = arith.index_cast %43 : i32 to index
      %c0_22 = arith.constant 0 : index
      %45 = vector.load %arg3[%c0_21, %44, %c0_22] : memref<1x128x32xf32, #tpu.memory_space<vmem>>, vector<1x128x32xf32>
      %46 = vector.shape_cast %45 : vector<1x128x32xf32> to vector<128x32xf32>
      %47 = arith.truncf %46 : vector<128x32xf32> to vector<128x32xbf16>
      %cst_23 = arith.constant dense<0.000000e+00> : vector<128x128xf32>
      %48 = tpu.matmul %47, %0, %cst_23 {dimension_numbers = #tpu.dot_dimension_numbers<[1], [0], [0], [1], [0, 0, 1, 1], [], []>} : vector<128x32xbf16>, vector<32x128xbf16>, vector<128x128xf32> -> vector<128x128xf32>
      %49 = arith.truncf %48 : vector<128x128xf32> to vector<128x128xbf16>
      %50 = arith.index_cast %43 : i32 to index
      %c0_24 = arith.constant 0 : index
      %51 = vector.load %arg8[%50, %c0_24] : memref<128x128xbf16, #tpu.memory_space<vmem>>, vector<128x128xbf16>
      tpu.vector_store %arg8[%50, %c0_24], %49 {strides = array<i32>} : memref<128x128xbf16, #tpu.memory_space<vmem>>, vector<128x128xbf16>,
      %c1_i32_25 = arith.constant 1 : i32
      %cst_26 = arith.constant 0xFF800000 : f32
      %52 = vector.broadcast %cst_26 : f32 to vector<1x128xf32>
      %c0_27 = arith.constant 0 : index
      %c0_28 = arith.constant 0 : index
      %c0_29 = arith.constant 0 : index
      %53 = vector.load %arg7[%c0_27, %c0_28, %c0_29] : memref<1x1x128xf32, #tpu.memory_space<vmem>>, vector<1x1x128xf32>
      %54 = vector.shape_cast %53 : vector<1x1x128xf32> to vector<1x128xf32>
      %55 = vector.shape_cast %52 : vector<1x128xf32> to vector<1x1x128xf32>
      tpu.vector_store %arg7[%c0_27, %c0_28, %c0_29], %55 {strides = array<i32>} : memref<1x1x128xf32, #tpu.memory_space<vmem>>, vector<1x1x128xf32>,
    } else {
    }
    %c1_i32 = arith.constant 1 : i32
    %5 = arith.muli %arg1, %c1_i32 : i32
    %6 = arith.addi %5, %arg2 : i32
    %c128_i32 = arith.constant 128 : i32
    %7 = arith.muli %6, %c128_i32 : i32
    %8 = tpu.assume_multiple %7, 128 : i32
    %c0_4 = arith.constant 0 : index
    %c0_5 = arith.constant 0 : index
    %c0_6 = arith.constant 0 : index
    %9 = vector.load %arg4[%c0_4, %c0_5, %c0_6] : memref<1x128x128xf32, #tpu.memory_space<vmem>>, vector<1x128x128xf32>
    %10 = vector.shape_cast %9 : vector<1x128x128xf32> to vector<128x128xf32>
    %11 = arith.truncf %10 : vector<128x128xf32> to vector<128x128xbf16>
    %c0_7 = arith.constant 0 : index
    %c0_8 = arith.constant 0 : index
    %12 = vector.load %arg8[%c0_7, %c0_8] : memref<128x128xbf16, #tpu.memory_space<vmem>>, vector<128x128xbf16>
    %cst = arith.constant dense<0.000000e+00> : vector<128x128xf32>
    %13 = tpu.matmul %11, %12, %cst {dimension_numbers = #tpu.dot_dimension_numbers<[1], [0], [0], [1], [0, 0, 1, 1], [], []>} : vector<128x128xbf16>, vector<128x128xbf16>, vector<128x128xf32> -> vector<128x128xf32>
    %14 = tpu.iota {dimensions = array<i32: 0>} : vector<128x1xi32>
    %15 = vector.broadcast %8 : i32 to vector<128x1xi32>
    %16 = arith.addi %15, %14 : vector<128x1xi32>
    %c8_i32 = arith.constant 8 : i32
    %17 = vector.broadcast %c8_i32 : i32 to vector<128x1xi32>
    %18 = arith.cmpi slt, %16, %17 : vector<128x1xi32>
    %19 = arith.index_cast %8 : i32 to index
    %c0_9 = arith.constant 0 : index
    %20 = vector.load %arg8[%19, %c0_9] : memref<128x128xbf16, #tpu.memory_space<vmem>>, vector<128x128xbf16>
    %21 = arith.extf %20 : vector<128x128xbf16> to vector<128x128xf32>
    %22 = tpu.iota {dimensions = array<i32: 1>} : vector<128x128xi32>
    %c4_i32 = arith.constant 4 : i32
    %23 = vector.broadcast %c4_i32 : i32 to vector<128x128xi32>
    %24 = arith.cmpi slt, %22, %23 : vector<128x128xi32>
    %25 = arith.select %24, %13, %21 : vector<128x128xi1>, vector<128x128xf32>
    %26 = vector.broadcast %1 : vector<1x128xf32> to vector<128x128xf32>
    %27 = arith.addf %25, %26 : vector<128x128xf32>
    %cst_10 = arith.constant 0.000000e+00 : f32
    %28 = vector.broadcast %cst_10 : f32 to vector<128x128xf32>
    %29 = arith.maximumf %27, %28 : vector<128x128xf32>
    %cst_11 = arith.constant 0xFF800000 : f32
    %30 = vector.shape_cast %18 : vector<128x1xi1> to vector<128x1xi1>
    %31 = vector.broadcast %30 : vector<128x1xi1> to vector<128x128xi1>
    %32 = vector.broadcast %cst_11 : f32 to vector<128x128xf32>
    %33 = arith.select %31, %29, %32 : vector<128x128xi1>, vector<128x128xf32>
    %c0_12 = arith.constant 0 : index
    %c0_13 = arith.constant 0 : index
    %c0_14 = arith.constant 0 : index
    %34 = vector.load %arg7[%c0_12, %c0_13, %c0_14] : memref<1x1x128xf32, #tpu.memory_space<vmem>>, vector<1x1x128xf32>
    %35 = vector.shape_cast %34 : vector<1x1x128xf32> to vector<1x128xf32>
    %cst_15 = arith.constant dense<0xFF800000> : vector<128xf32>
    %36 = vector.multi_reduction <maximumf>, %33, %cst_15 [0] : vector<128x128xf32> to vector<128xf32>
    %37 = vector.shape_cast %36 : vector<128xf32> to vector<1x128xf32>
    %38 = arith.maximumf %35, %37 : vector<1x128xf32>
    %c0_16 = arith.constant 0 : index
    %c0_17 = arith.constant 0 : index
    %c0_18 = arith.constant 0 : index
    %39 = vector.load %arg7[%c0_16, %c0_17, %c0_18] : memref<1x1x128xf32, #tpu.memory_space<vmem>>, vector<1x1x128xf32>
    %40 = vector.shape_cast %39 : vector<1x1x128xf32> to vector<1x128xf32>
    %41 = vector.shape_cast %38 : vector<1x128xf32> to vector<1x1x128xf32>
    tpu.vector_store %arg7[%c0_16, %c0_17, %c0_18], %41 {strides = array<i32>} : memref<1x1x128xf32, #tpu.memory_space<vmem>>, vector<1x1x128xf32>,
    return
  }
  func.func @transform_0(%arg0: i32, %arg1: i32, %arg2: i32) -> (i32, i32, i32) {
    %c0_i32 = arith.constant 0 : i32
    %c0_i32_0 = arith.constant 0 : i32
    %c0_i32_1 = arith.constant 0 : i32
    return %arg0, %c0_i32, %c0_i32_0 : i32, i32, i32
  }
  func.func @transform_1(%arg0: i32, %arg1: i32, %arg2: i32) -> (i32, i32, i32) {
    %c1_i32 = arith.constant 1 : i32
    %0 = arith.muli %arg1, %c1_i32 : i32
    %1 = arith.addi %0, %arg2 : i32
    %c0_i32 = arith.constant 0 : i32
    %c0_i32_0 = arith.constant 0 : i32
    return %arg0, %1, %c0_i32 : i32, i32, i32
  }
  func.func @transform_2(%arg0: i32, %arg1: i32, %arg2: i32) -> (i32, i32) {
    %c0_i32 = arith.constant 0 : i32
    %c0_i32_0 = arith.constant 0 : i32
    %c0_i32_1 = arith.constant 0 : i32
    return %c0_i32, %c0_i32_0 : i32, i32
  }
  func.func @transform_3(%arg0: i32, %arg1: i32, %arg2: i32) -> (i32, i32) {
    %c0_i32 = arith.constant 0 : i32
    %c0_i32_0 = arith.constant 0 : i32
    %c0_i32_1 = arith.constant 0 : i32
    return %c0_i32, %c0_i32_0 : i32, i32
  }
  func.func @transform_4(%arg0: i32, %arg1: i32, %arg2: i32) -> (i32, i32, i32) {
    %c1_i32 = arith.constant 1 : i32
    %0 = arith.muli %arg0, %c1_i32 : i32
    %1 = arith.addi %0, %arg1 : i32
    %c0_i32 = arith.constant 0 : i32
    %c0_i32_0 = arith.constant 0 : i32
    %c0_i32_1 = arith.constant 0 : i32
    return %1, %c0_i32, %c0_i32_0 : i32, i32, i32
  }
}

</mosaic_0001>

<bundles_post_ra>
// kernel: tpu_custom_call.1
= control target key start
LH: loop header
LB: loop body
LE: loop exit
PB: predicated region body
PF: predicated region fallthrough
CT: control target
= control target key end

     0   :  { %vm87_vm0 = vcmask 261120   ;;  %s881_s0 = inlined_call_operand.vmem [shape: f32[1,128,32], index: 0, kind: input, shape index: {}]   ;;  %s882_s1 = inlined_call_operand.vmem [shape: f32[1,128,128], index: 1, kind: input, shape index: {}]   ;;  %s883_s2 = inlined_call_operand.vmem [shape: bf16[32,128], index: 2, kind: input, shape index: {}]   ;;  %s884_s3 = inlined_call_operand.vmem [shape: f32[1,128], index: 3, kind: input, shape index: {}]   ;;  %s885_s4 = inlined_call_operand.hbm [shape: f32[1,1,128], index: 4, kind: output, shape index: {}]  }
   0x1   :  { %v696_v0 = vld [vmem:[%s883_s2] sm:$0xff]   ;;  %v697_v1 = vld [vmem:[%s883_s2 + $0x8] sm:$0xff]   ;;  %v53_v5 = vld [vmem:[%s881_s0 + $0x10] sm:$0xff] }
   0x2   :  { %626 = vmatprep.subr.bf16.mxu0 %v696_v0  ;;  %v51_v2 = vld [vmem:[%s881_s0] sm:$0xff]  ;;  %v52_v3 = vld [vmem:[%s881_s0 + $0x8] sm:$0xff]  ;;  %v54_v6 = vld [vmem:[%s881_s0 + $0x18] sm:$0xff] }
   0x3   :  { %627 = vmatpush3.bf16.msra.mxu0 %v696_v0  ;;  %v67_v4 = vpack.c.bf16 %v52_v3, %v51_v2  ;;  %v55_v7 = vld [vmem:[%s881_s0 + $0x20] sm:$0xff]  ;;  %v56_v8 = vld [vmem:[%s881_s0 + $0x28] sm:$0xff]  ;;  %v68_v9 = vpack.c.bf16 %v54_v6, %v53_v5 }
   0x4   :  { %628 = vmatprep.subr.bf16.mxu0 %v697_v1  ;;  %v69_v10 = vpack.c.bf16 %v56_v8, %v55_v7 }
   0x5   :  { %630 = vmatprep.mubr.msk.bf16.mxu0 %vm87_vm0, %v67_v4 }
   0x7   :  { %629 = vmatpush3.bf16.msra.mxu0 %v697_v1 }
   0x8   :  { %9 = vsyncpa [#allocation4], 0  ;;  %v57_v11 = vld [vmem:[%s881_s0 + $0x30] sm:$0xff]  ;;  %v58_v12 = vld [vmem:[%s881_s0 + $0x38] sm:$0xff] }
   0x9   :  { %v59_v13 = vld [vmem:[%s881_s0 + $0x40] sm:$0xff]  ;;  %v60_v14 = vld [vmem:[%s881_s0 + $0x48] sm:$0xff]  ;;  %v70_v15 = vpack.c.bf16 %v58_v12, %v57_v11  ;;  %v61_v17 = vld [vmem:[%s881_s0 + $0x50] sm:$0xff]  ;;  %v435_v11 = vlaneseq }
   0xa   :  { %631 = vmatmul.mubr.msk.bf16.vlgmr.msra.gmra.mrb[0].mxu0 %vm87_vm0, %v68_v9  ;;  %v71_v16 = vpack.c.bf16 %v60_v14, %v59_v13  ;;  %v62_v18 = vld [vmem:[%s881_s0 + $0x58] sm:$0xff]  ;;  %v63_v19 = vld [vmem:[%s881_s0 + $0x60] sm:$0xff]  ;;  %v64_v20 = vld [vmem:[%s881_s0 + $0x68] sm:$0xff] }
   0xb   :  { %634 = vmatprep.mubr.msk.bf16.mxu0 %vm87_vm0, %v69_v10  ;;  %v72_v21 = vpack.c.bf16 %v62_v18, %v61_v17  ;;  %v73_v22 = vpack.c.bf16 %v64_v20, %v63_v19  ;;  %v65_v23 = vld [vmem:[%s881_s0 + $0x70] sm:$0xff]  ;;  %v66_v24 = vld [vmem:[%s881_s0 + $0x78] sm:$0xff]  ;;  %v228_v26 = vld [vmem:[%s882_s1] sm:$0xff]  ;;  %v722_v10 = vmov -inf   ;;  %v436_v12 = vand.u32 127, %v435_v11 }
   0xc   :  { %v74_v25 = vpack.c.bf16 %v66_v24, %v65_v23  ;;  %v229_v27 = vld [vmem:[%s882_s1 + $0x8] sm:$0xff]  ;;  %v232_v28 = vld [vmem:[%s882_s1 + $0x20] sm:$0xff]  ;;  %v230_v56 = vld [vmem:[%s882_s1 + $0x10] sm:$0xff]  ;;  %225 = vst [vmem:[#allocation3] sm:$0x1] %v722_v10 }
   0xd   :  { %v244_v29 = vpack.c.bf16 %v229_v27, %v228_v26  ;;  %v233_v30 = vld [vmem:[%s882_s1 + $0x28] sm:$0xff]  ;;  %v231_v57 = vld [vmem:[%s882_s1 + $0x18] sm:$0xff]  ;;  %v234_v58 = vld [vmem:[%s882_s1 + $0x30] sm:$0xff]  ;;  %vm437_vm1 = vcmp.lt.s32.totalorder %v436_v12, 4 }
   0xe   :  { %v246_v31 = vpack.c.bf16 %v233_v30, %v232_v28  ;;  %v235_v59 = vld [vmem:[%s882_s1 + $0x38] sm:$0xff]  ;;  %v236_v60 = vld [vmem:[%s882_s1 + $0x40] sm:$0xff]  ;;  %v237_v61 = vld [vmem:[%s882_s1 + $0x48] sm:$0xff]  ;;  %v245_v62 = vpack.c.bf16 %v231_v57, %v230_v56 }
   0xf   :  { %v247_v63 = vpack.c.bf16 %v235_v59, %v234_v58  ;;  %v248_v0 = vpack.c.bf16 %v237_v61, %v236_v60  ;;  %v238_v1 = vld [vmem:[%s882_s1 + $0x50] sm:$0xff]  ;;  %v239_v2 = vld [vmem:[%s882_s1 + $0x58] sm:$0xff]  ;;  %v240_v3 = vld [vmem:[%s882_s1 + $0x60] sm:$0xff] }
  0x10   :  { %666 = vmatprep.mubr.bf16.mxu1 %v246_v31  ;;  %v241_v4 = vld [vmem:[%s882_s1 + $0x68] sm:$0xff]  ;;  %v249_v5 = vpack.c.bf16 %v239_v2, %v238_v1  ;;  %v242_v7 = vld [vmem:[%s882_s1 + $0x70] sm:$0xff]  ;;  %v243_v8 = vld [vmem:[%s882_s1 + $0x78] sm:$0xff]  ;;  %s723_s1 = smov [#allocation3]  }
  0x11   :  { %v250_v6 = vpack.c.bf16 %v241_v4, %v240_v3  ;;  %v251_v9 = vpack.c.bf16 %v243_v8, %v242_v7  ;;  %v599_v14 = vld [vmem:[%s884_s3] ss:$0 sm:$0xff]  ;;  %s573_s3 = sshll.u32 %s723_s1, 4  ;;  %s574_s3 = int_to_ptr.vmem [resolvable:$true] %s573_s3 }
  0x12   :  { %635 = vmatmul.mubr.msk.bf16.gmra.mrb[4].mxu0 %vm87_vm0, %v70_v15  ;;  %s698_s29 = scalar_lea.vmem %s574_s3, 16  ;;  %s702_s30 = scalar_lea.vmem %s574_s3, 32 }
  0x13   :  { %638 = vmatprep.mubr.msk.bf16.mxu0 %vm87_vm0, %v71_v16  ;;  %p699_p0 = scmp.ne.s32.totalorder %s574_s3, %s698_s29  ;;  %p703_p1 = scmp.lt.s32.totalorder %s574_s3, %s574_s3 }
  0x14   :  { %p704_p2 = scmp.lt.s32.totalorder %s702_s30, %s698_s29 }
  0x16   :  { %p705_p3 = por %p704_p2, %p703_p1 }
  0x18   :  { %p706_p4 = pnand %p705_p3, %p699_p0 }
  0x1a   :  { %639 = vmatmul.mubr.msk.bf16.gmra.mrb[8].mxu0 %vm87_vm0, %v72_v21 }
  0x1b   :  { %642 = vmatprep.mubr.msk.bf16.mxu0 %vm87_vm0, %v73_v22 }
  0x22   :  { %643 = vmatmul.mubr.msk.bf16.gmra.mrb[12].mxu0 %vm87_vm0, %v74_v25 }
  0x23   :  { %662 = vmatprep.mubr.bf16.mxu0 %v244_v29 }
  0xdd   :  { %v632_v32 = vpop.f32.mrb[0].mxu0 }
  0xde   :  { %v146_v33 = vpop.f32.mrb[1].mxu0 }
  0xdf   :  { %v633_v34 = vpop.f32.mrb[2].mxu0 }
  0xe0   :  { %v210_v35 = vpack.c.bf16 %v633_v34, %v632_v32  ;;  %v149_v36 = vpop.f32.mrb[3].mxu0 }
  0xe1   :  { %v823_v37 = vpack.c.bf16 %v149_v36, %v146_v33  ;;  %v540_v36 = vld [vmem:[#allocation3] sm:$0x1] }
  0xe3   :  { %646 = vmatprep.subr.bf16.mxu0 %v823_v37  ;;  %678 = vmatprep.subr.bf16.mxu1 %v823_v37  ;;  %v419_v15 = vunpack.c.l.bf16 %v823_v37 }
  0xe4   :  { %647 = vmatpush3.bf16.msra.mxu0 %v823_v37  ;;  %686 = vmatpush3.bf16.msra.mxu1 %v823_v37 }
  0xe5   :  { %v636_v38 = vpop.f32.mrb[4].mxu0  ;;  %648 = vmatprep.subr.bf16.mxu0 %v210_v35  ;;  %679 = vmatprep.subr.bf16.mxu1 %v210_v35 }
  0xe6   :  { %v162_v39 = vpop.f32.mrb[5].mxu0 }
  0xe7   :  { %v637_v40 = vpop.f32.mrb[6].mxu0 }
  0xe8   :  { %v212_v41 = vpack.c.bf16 %v637_v40, %v636_v38  ;;  %v165_v42 = vpop.f32.mrb[7].mxu0  ;;  %649 = vmatpush3.bf16.msra.mxu0 %v210_v35  ;;  %687 = vmatpush3.bf16.msra.mxu1 %v210_v35 }
  0xe9   :  { %v211_v43 = vpack.c.bf16 %v165_v42, %v162_v39 }
  0xeb   :  { %650 = vmatprep.subr.bf16.mxu0 %v211_v43  ;;  %680 = vmatprep.subr.bf16.mxu1 %v211_v43 }
  0xec   :  { %651 = vmatpush3.bf16.msra.mxu0 %v211_v43  ;;  %688 = vmatpush3.bf16.msra.mxu1 %v211_v43 }
  0xed   :  { %v640_v44 = vpop.f32.mrb[8].mxu0  ;;  %652 = vmatprep.subr.bf16.mxu0 %v212_v41  ;;  %681 = vmatprep.subr.bf16.mxu1 %v212_v41 }
  0xee   :  { %v178_v45 = vpop.f32.mrb[9].mxu0 }
  0xef   :  { %v641_v46 = vpop.f32.mrb[10].mxu0 }
  0xf0   :  { %v214_v47 = vpack.c.bf16 %v641_v46, %v640_v44  ;;  %v181_v48 = vpop.f32.mrb[11].mxu0  ;;  %653 = vmatpush3.bf16.msra.mxu0 %v212_v41  ;;  %689 = vmatpush3.bf16.msra.mxu1 %v212_v41 }
  0xf1   :  { %v213_v49 = vpack.c.bf16 %v181_v48, %v178_v45 }
  0xf3   :  { %654 = vmatprep.subr.bf16.mxu0 %v213_v49  ;;  %682 = vmatprep.subr.bf16.mxu1 %v213_v49 }
  0xf4   :  { %655 = vmatpush3.bf16.msra.mxu0 %v213_v49  ;;  %690 = vmatpush3.bf16.msra.mxu1 %v213_v49 }
  0xf5   :  { %v644_v50 = vpop.f32.mrb[12].mxu0  ;;  %656 = vmatprep.subr.bf16.mxu0 %v214_v47  ;;  %683 = vmatprep.subr.bf16.mxu1 %v214_v47 }
  0xf6   :  { %v194_v51 = vpop.f32.mrb[13].mxu0 }
  0xf7   :  { %v645_v52 = vpop.f32.mrb[14].mxu0 }
  0xf8   :  { %v216_v53 = vpack.c.bf16 %v645_v52, %v644_v50  ;;  %v197_v54 = vpop.f32.mrb[15].mxu0  ;;  %657 = vmatpush3.bf16.msra.mxu0 %v214_v47  ;;  %691 = vmatpush3.bf16.msra.mxu1 %v214_v47 }
  0xf9   :  { %v215_v55 = vpack.c.bf16 %v197_v54, %v194_v51 }
  0xfb   :  { %658 = vmatprep.subr.bf16.mxu0 %v215_v55  ;;  %684 = vmatprep.subr.bf16.mxu1 %v215_v55 }
  0xfc   :  { %659 = vmatpush3.bf16.msra.mxu0 %v215_v55  ;;  %692 = vmatpush3.bf16.msra.mxu1 %v215_v55 }
  0xfd   :  { %660 = vmatprep.subr.bf16.mxu0 %v216_v53  ;;  %685 = vmatprep.subr.bf16.mxu1 %v216_v53 }
 0x100   :  { %661 = vmatpush3.bf16.msra.mxu0 %v216_v53  ;;  %693 = vmatpush3.bf16.msra.mxu1 %v216_v53 }
 0x103   :  { %663 = vmatmul.mubr.bf16.vlgmr.msra.gmra.mrb[16].mxu0 %v245_v62  ;;  %667 = vmatmul.mubr.bf16.vlgmr.msra.gmra.mrb[0].mxu1 %v247_v63 }
 0x104   :  { %670 = vmatprep.mubr.bf16.mxu1 %v248_v0 }
 0x10b   :  { %671 = vmatmul.mubr.bf16.gmra.mrb[4].mxu1 %v249_v5 }
 0x10c   :  { %674 = vmatprep.mubr.bf16.mxu1 %v250_v6 }
 0x113   :  { %675 = vmatmul.mubr.bf16.gmra.mrb[8].mxu1 %v251_v9 }
 0x1d6   :  { %v664_v13 = vpop.f32.mrb[16].mxu0  ;;  %v668_v16 = vpop.f32.mrb[0].mxu1 }
 0x1d7   :  { %v294_v17 = vpop.f32.mrb[17].mxu0  ;;  %v310_v18 = vpop.f32.mrb[1].mxu1 }
 0x1d8   :  { %v438_v19 = vsel %vm437_vm1, %v294_v17, %v419_v15  ;;  %v665_v20 = vpop.f32.mrb[18].mxu0  ;;  %v669_v21 = vpop.f32.mrb[2].mxu1 }
 0x1d9   :  { %v460_v22 = vadd.f32 %v599_v14, %v438_v19  ;;  %v297_v23 = vpop.f32.mrb[19].mxu0  ;;  %v313_v24 = vpop.f32.mrb[3].mxu1 }
 0x1db   :  { %v476_v25 = vmax.f32 %v460_v22, 0.0 }
 0x1dd   :  { %v556_v26 = vrot.slane %v476_v25, 4 }
 0x1de   :  { %v672_v27 = vpop.f32.mrb[4].mxu1 }
 0x1df   :  { %v557_v28 = vmax.f32 %v476_v25, %v556_v26  ;;  %v326_v29 = vpop.f32.mrb[5].mxu1 }
 0x1e0   :  { %v673_v30 = vpop.f32.mrb[6].mxu1 }
 0x1e1   :  { %v558_v31 = vrot.slane %v557_v28, 2  ;;  %v329_v32 = vpop.f32.mrb[7].mxu1 }
 0x1e3   :  { %v559_v33 = vmax.f32 %v557_v28, %v558_v31 }
 0x1e5   :  { %v560_v34 = vrot.slane %v559_v33, 1 }
 0x1e6   :  { %v676_v35 = vpop.f32.mrb[8].mxu1 }
 0x1e7   :  { %v342_v37 = vpop.f32.mrb[9].mxu1  ;;  %v561_v38 = vmax.f32 %v559_v33, %v560_v34 }
 0x1e8   :  { %v677_v39 = vpop.f32.mrb[10].mxu1 }
 0x1e9   :  { %v345_v40 = vpop.f32.mrb[11].mxu1  ;;  %v562_v41 = vmax.f32 %v540_v36, %v561_v38 }
 0x1eb   :  { %563 = vst [vmem:[#allocation3] sm:$0x1] %v562_v41 }
 0x1ec   :  { %709 = shalt.err (!%p706_p4)
}
 0x1ed   :  { %s710_s6 = scalar_lea.hbm %s885_s4, 16 }
 0x1ee   :  { %p711_p5 = scmp.ne.s32.totalorder %s885_s4, %s710_s6  ;;  %p714_p6 = scmp.lt.u32.totalorder %s710_s6, %s885_s4 }
 0x1f0   :  { %p716_p7 = pnand %p714_p6, %p711_p5 }
 0x1f2   :  { %719 = shalt.err (!%p716_p7)
}
 0x1f3   :  { %576 = dma.vmem_to_hbm [thread:$0]  %s574_s3, 16, %s885_s4, [#allocation4]  }
 0x1f4   :  { %720 = dma.done.wait [#allocation4], 16  }
 0x1f5   :  { %721 = vsyncadd [#allocation4], 4294967280 }
 0x1f6   :  { %580 = vsyncpa [#allocation4], 1 }

</bundles_post_ra>
